<compile_context>
chip_gen: v7x
topology: tpu7x:2x2x1
jax: 0.10.0
libtpu: 0.0.40
codegen_flags: <defaults>
</compile_context>

<pallas_src>
import jax
import jax.numpy as jnp
from jax.experimental import pallas as pl
from jax.experimental.pallas import tpu as pltpu


def _discriminator_kernel(x1_ref, x2_ref, w1_ref, w2_ref, b_ref, o_ref):
    # logits = cat([a1, a2], 1) @ Wd + bd, with the disc layer pre-folded into
    # the per-view weights: logits = x1 @ W1f + x2 @ W2f + bf   -> (tile_b, 2)
    logits = (jnp.dot(x1_ref[...], w1_ref[...],
                      preferred_element_type=jnp.float32)
              + jnp.dot(x2_ref[...], w2_ref[...],
                        preferred_element_type=jnp.float32)
              + b_ref[...])

    s = jax.nn.sigmoid(logits)                      # EUP transcendental
    # 2-class softmax: softmax([s0, s1]) == [sigmoid(s0 - s1), 1 - sigmoid(...)]
    p0 = jax.nn.sigmoid(s[:, 0:1] - s[:, 1:2])
    out = jnp.concatenate([p0, 1.0 - p0], axis=-1)
    o_ref[...] = out.astype(o_ref.dtype)


def _vmem_capacity_bytes():
    try:
        return int(pltpu.get_tpu_info().vmem_capacity_bytes)
    except Exception:
        return 64 * 1024 * 1024                     # conservative (v7x per-TC)


def _pick_tile_b(B, D, vmem_capacity):
    """Multiple-of-8 batch tile, sized by bytes against the generation's VMEM.

    - ~8 MiB per x block on 128 MiB parts (v5e/v6e), ~4 MiB on v7x (64 MiB).
      2 inputs x 2 pipeline buffers x budget stays well under the scoped limit.
    - For B > 16 cap at ~B/2 so the grid has >= 2 steps (v7x megacore sharding).
    """
    if B <= 16:
        return B                                    # full-dim block is legal
    if vmem_capacity >= 96 * 1024 * 1024:           # v5e / v6e
        budget = 8 * 1024 * 1024
    else:                                           # v7x
        budget = 4 * 1024 * 1024
    rows = max(8, budget // (D * 4))
    half = max(8, (pl.cdiv(B, 2) // 8) * 8)         # guarantee >= 2 grid steps
    tb = min(rows, half, B)
    return max(8, (tb // 8) * 8)


def discriminator_forward(x1, v1, x2, v2, params, *, tile_b=None):
    """x1, x2: (B, input_dim) f32; v1, v2: python ints selecting align heads.

    params = (align_w, align_b, disc_w, disc_b) with
      align_w: (V, input_dim, H), align_b: (V, H)   [weights stored (in, out)]
      disc_w:  (2*H, 2),          disc_b: (2,)
    """
    align_w, align_b, disc_w, disc_b = params
    B, D = x1.shape
    H = align_w.shape[-1]

    # Static (python int) view selection, mirroring the ModuleList indexing.
    w1, b1 = align_w[v1], align_b[v1]
    w2, b2 = align_w[v2], align_b[v2]
    wd1, wd2 = disc_w[:H], disc_w[H:]

    # Fold the disc layer into the align weights (exact; done once, tiny cost).
    w1f = jnp.dot(w1, wd1, preferred_element_type=jnp.float32)      # (D, 2)
    w2f = jnp.dot(w2, wd2, preferred_element_type=jnp.float32)      # (D, 2)
    bf = (jnp.dot(b1, wd1, preferred_element_type=jnp.float32)
          + jnp.dot(b2, wd2, preferred_element_type=jnp.float32)
          + disc_b).reshape(1, 2)

    vmem_capacity = _vmem_capacity_bytes()
    if tile_b is None:
        tile_b = _pick_tile_b(B, D, vmem_capacity)
    else:
        tile_b = B if tile_b >= B else max(8, (tile_b // 8) * 8)

    grid = (pl.cdiv(B, tile_b),)
    vmem_limit = int(min(vmem_capacity * 3 // 4, 96 * 1024 * 1024))

    return pl.pallas_call(
        _discriminator_kernel,
        out_shape=jax.ShapeDtypeStruct((B, 2), x1.dtype),
        grid_spec=pltpu.PrefetchScalarGridSpec(
            num_scalar_prefetch=0,
            grid=grid,
            in_specs=[
                pl.BlockSpec((tile_b, D), lambda i: (i, 0)),   # x1 tile
                pl.BlockSpec((tile_b, D), lambda i: (i, 0)),   # x2 tile
                pl.BlockSpec((D, 2), lambda i: (0, 0)),        # fused W view v1
                pl.BlockSpec((D, 2), lambda i: (0, 0)),        # fused W view v2
                pl.BlockSpec((1, 2), lambda i: (0, 0)),        # fused bias
            ],
            # Output is only B*8 bytes; lane-dense padding of the out block is
            # intentionally skipped (store cost is negligible here).
            out_specs=pl.BlockSpec((tile_b, 2), lambda i: (i, 0)),
        ),
        compiler_params=pltpu.CompilerParams(
            dimension_semantics=("parallel",),
            vmem_limit_bytes=vmem_limit,
        ),
    )(x1, x2, w1f, w2f, bf)


def _reference(x1, v1, x2, v2, params):
    align_w, align_b, disc_w, disc_b = params
    a1 = x1 @ align_w[v1] + align_b[v1]
    a2 = x2 @ align_w[v2] + align_b[v2]
    d = jnp.concatenate([a1, a2], axis=1) @ disc_w + disc_b
    d = jax.nn.sigmoid(d)
    return jax.nn.softmax(d, axis=1)


def _make_params(key, input_dim, V, H):
    keys = jax.random.split(key, 4)
    # PyTorch nn.Linear-style init: U(-1/sqrt(fan_in), 1/sqrt(fan_in)),
    # weights stored already transposed as (in_features, out_features).
    lim_a = 1.0 / (input_dim ** 0.5)
    lim_d = 1.0 / ((2 * H) ** 0.5)
    align_w = jax.random.uniform(keys[0], (V, input_dim, H), jnp.float32,
                                 -lim_a, lim_a)
    align_b = jax.random.uniform(keys[1], (V, H), jnp.float32, -lim_a, lim_a)
    disc_w = jax.random.uniform(keys[2], (2 * H, 2), jnp.float32, -lim_d, lim_d)
    disc_b = jax.random.uniform(keys[3], (2,), jnp.float32, -lim_d, lim_d)
    return (align_w, align_b, disc_w, disc_b)


def _check(B, input_dim, V, H, key, v1, v2):
    kx1, kx2, kp = jax.random.split(key, 3)
    x1 = jax.random.normal(kx1, (B, input_dim), dtype=jnp.float32)
    x2 = jax.random.normal(kx2, (B, input_dim), dtype=jnp.float32)
    params = _make_params(kp, input_dim, V, H)

    out = jax.block_until_ready(discriminator_forward(x1, v1, x2, v2, params))
    ref = _reference(x1, v1, x2, v2, params)

    assert out.shape == (B, 2)
    assert jnp.allclose(out, ref, atol=1e-5, rtol=1e-5), "mismatch vs reference"
    assert jnp.allclose(jnp.sum(out, axis=1), jnp.ones((B,)), atol=1e-5)


if __name__ == "__main__":
    key = jax.random.PRNGKey(0)
    k1, k2 = jax.random.split(key)

    # Small single-grid-step case (matches the module's tiny shapes).
    _check(B=8, input_dim=32, V=3, H=100, key=k1, v1=0, v2=2)
    # Multi-grid-step case (exercises the batch-tiled "parallel" grid path).
    _check(B=64, input_dim=32, V=3, H=100, key=k2, v1=1, v2=0)

    print("KERNEL_OK")
</pallas_src>

<mosaic_0001>
module attributes {stable_mosaic.version = 11 : i64} {
  func.func @_discriminator_kernel(%arg0: i32, %arg1: memref<8x32xf32, #tpu.memory_space<vmem>>, %arg2: memref<8x32xf32, #tpu.memory_space<vmem>>, %arg3: memref<32x2xf32, #tpu.memory_space<vmem>>, %arg4: memref<32x2xf32, #tpu.memory_space<vmem>>, %arg5: memref<1x2xf32, #tpu.memory_space<vmem>>, %arg6: memref<8x2xf32, #tpu.memory_space<vmem>>) attributes {dimension_semantics = [#tpu.dimension_semantics<parallel>], iteration_bounds = array<i64: 1>, scalar_prefetch = 0 : i64, scratch_operands = 0 : i64, tpu.core_type = #tpu.core_type<tc>, window_params = [{transform_indices = @transform_0, window_bounds = array<i64: 8, 32>}, {transform_indices = @transform_1, window_bounds = array<i64: 8, 32>}, {pipeline_mode = #tpu.pipeline_mode<synchronous>, transform_indices = @transform_2, window_bounds = array<i64: 32, 2>}, {pipeline_mode = #tpu.pipeline_mode<synchronous>, transform_indices = @transform_3, window_bounds = array<i64: 32, 2>}, {pipeline_mode = #tpu.pipeline_mode<synchronous>, transform_indices = @transform_4, window_bounds = array<i64: 1, 2>}, {transform_indices = @transform_5, window_bounds = array<i64: 8, 2>}]} {
    %c0 = arith.constant 0 : index
    %c0_0 = arith.constant 0 : index
    %0 = vector.load %arg1[%c0, %c0_0] : memref<8x32xf32, #tpu.memory_space<vmem>>, vector<8x32xf32>
    %c0_1 = arith.constant 0 : index
    %c0_2 = arith.constant 0 : index
    %1 = vector.load %arg3[%c0_1, %c0_2] : memref<32x2xf32, #tpu.memory_space<vmem>>, vector<32x2xf32>
    %cst = arith.constant dense<0.000000e+00> : vector<8x2xf32>
    %2 = tpu.matmul %0, %1, %cst {dimension_numbers = #tpu.dot_dimension_numbers<[1], [0], [0], [1], [0, 0, 1, 1], [], []>} : vector<8x32xf32>, vector<32x2xf32>, vector<8x2xf32> -> vector<8x2xf32>
    %c0_3 = arith.constant 0 : index
    %c0_4 = arith.constant 0 : index
    %3 = vector.load %arg2[%c0_3, %c0_4] : memref<8x32xf32, #tpu.memory_space<vmem>>, vector<8x32xf32>
    %c0_5 = arith.constant 0 : index
    %c0_6 = arith.constant 0 : index
    %4 = vector.load %arg4[%c0_5, %c0_6] : memref<32x2xf32, #tpu.memory_space<vmem>>, vector<32x2xf32>
    %cst_7 = arith.constant dense<0.000000e+00> : vector<8x2xf32>
    %5 = tpu.matmul %3, %4, %cst_7 {dimension_numbers = #tpu.dot_dimension_numbers<[1], [0], [0], [1], [0, 0, 1, 1], [], []>} : vector<8x32xf32>, vector<32x2xf32>, vector<8x2xf32> -> vector<8x2xf32>
    %6 = arith.addf %2, %5 : vector<8x2xf32>
    %c0_8 = arith.constant 0 : index
    %c0_9 = arith.constant 0 : index
    %7 = vector.load %arg5[%c0_8, %c0_9] : memref<1x2xf32, #tpu.memory_space<vmem>>, vector<1x2xf32>
    %8 = vector.broadcast %7 : vector<1x2xf32> to vector<8x2xf32>
    %9 = arith.addf %6, %8 : vector<8x2xf32>
    %10 = arith.negf %9 : vector<8x2xf32>
    %11 = math.exp %10 : vector<8x2xf32>
    %cst_10 = arith.constant 1.000000e+00 : f32
    %12 = vector.broadcast %cst_10 : f32 to vector<8x2xf32>
    %13 = arith.addf %12, %11 : vector<8x2xf32>
    %14 = arith.divf %12, %13 : vector<8x2xf32>
    %15 = vector.extract_strided_slice %14 {offsets = [0, 0], sizes = [8, 1], strides = [1, 1]} : vector<8x2xf32> to vector<8x1xf32>
    %16 = vector.extract_strided_slice %14 {offsets = [0, 1], sizes = [8, 1], strides = [1, 1]} : vector<8x2xf32> to vector<8x1xf32>
    %17 = arith.subf %15, %16 : vector<8x1xf32>
    %18 = arith.negf %17 : vector<8x1xf32>
    %19 = math.exp %18 : vector<8x1xf32>
    %cst_11 = arith.constant 1.000000e+00 : f32
    %20 = vector.broadcast %cst_11 : f32 to vector<8x1xf32>
    %21 = arith.addf %20, %19 : vector<8x1xf32>
    %22 = arith.divf %20, %21 : vector<8x1xf32>
    %cst_12 = arith.constant 1.000000e+00 : f32
    %23 = vector.broadcast %cst_12 : f32 to vector<8x1xf32>
    %24 = arith.subf %23, %22 : vector<8x1xf32>
    %25 = tpu.concatenate %22, %24 in 1 : vector<8x1xf32>, vector<8x1xf32> -> vector<8x2xf32>
    %c0_13 = arith.constant 0 : index
    %c0_14 = arith.constant 0 : index
    %26 = vector.load %arg6[%c0_13, %c0_14] : memref<8x2xf32, #tpu.memory_space<vmem>>, vector<8x2xf32>
    tpu.vector_store %arg6[%c0_13, %c0_14], %25 {strides = array<i32>} : memref<8x2xf32, #tpu.memory_space<vmem>>, vector<8x2xf32>,
    return
  }
  func.func @transform_0(%arg0: i32) -> (i32, i32) {
    %c0_i32 = arith.constant 0 : i32
    %c0_i32_0 = arith.constant 0 : i32
    return %arg0, %c0_i32 : i32, i32
  }
  func.func @transform_1(%arg0: i32) -> (i32, i32) {
    %c0_i32 = arith.constant 0 : i32
    %c0_i32_0 = arith.constant 0 : i32
    return %arg0, %c0_i32 : i32, i32
  }
  func.func @transform_2(%arg0: i32) -> (i32, i32) {
    %c0_i32 = arith.constant 0 : i32
    %c0_i32_0 = arith.constant 0 : i32
    %c0_i32_1 = arith.constant 0 : i32
    return %c0_i32, %c0_i32_0 : i32, i32
  }
  func.func @transform_3(%arg0: i32) -> (i32, i32) {
    %c0_i32 = arith.constant 0 : i32
    %c0_i32_0 = arith.constant 0 : i32
    %c0_i32_1 = arith.constant 0 : i32
    return %c0_i32, %c0_i32_0 : i32, i32
  }
  func.func @transform_4(%arg0: i32) -> (i32, i32) {
    %c0_i32 = arith.constant 0 : i32
    %c0_i32_0 = arith.constant 0 : i32
    %c0_i32_1 = arith.constant 0 : i32
    return %c0_i32, %c0_i32_0 : i32, i32
  }
  func.func @transform_5(%arg0: i32) -> (i32, i32) {
    %c0_i32 = arith.constant 0 : i32
    %c0_i32_0 = arith.constant 0 : i32
    return %arg0, %c0_i32 : i32, i32
  }
}

</mosaic_0001>

<bundles_post_ra>
// kernel: tpu_custom_call.1
= control target key start
LH: loop header
LB: loop body
LE: loop exit
PB: predicated region body
PF: predicated region fallthrough
CT: control target
= control target key end

     0   :  { %v277_v0 = vmov 0.0|0.0   ;;  %vm278_vm0 = vmmov 0   ;;  %v279_v8 = vmov 0.0   ;;  %vm30_vm1 = vcmask 261120   ;;  %s348_s3 = inlined_call_operand.vmem [shape: f32[32,2], index: 3, kind: input, shape index: {}]   ;;  %s349_s2 = inlined_call_operand.vmem [shape: f32[32,2], index: 2, kind: input, shape index: {}]   ;;  %s350_s1 = inlined_call_operand.vmem [shape: f32[8,32], index: 1, kind: input, shape index: {}]   ;;  %s351_s0 = inlined_call_operand.vmem [shape: f32[8,32], index: 0, kind: input, shape index: {}]   ;;  %s352_s4 = inlined_call_operand.vmem [shape: f32[1,2], index: 4, kind: input, shape index: {}]   ;;  %s353_s5 = inlined_call_operand.vmem [shape: f32[8,2], index: 5, kind: output, shape index: {}]  }
   0x1   :  { %252 = vmatprep.subr.bf16.mxu0 %v277_v0  ;;  %258 = vmatprep.subr.bf16.mxu1 %v277_v0  ;;  %v26_v1 = vld [vmem:[%s348_s3] sm:$0xff]  ;;  %v27_v2 = vld [vmem:[%s348_s3 + $0x8] sm:$0xff]  ;;  %v28_v6 = vld [vmem:[%s348_s3 + $0x10] sm:$0xff]  ;;  %vm207_vm2 = vcmask 7168   ;;  %vm209_vm3 = vcmask 15360  }
   0x2   :  { %v21_v3 = vld [vmem:[%s349_s2] sm:$0xff]  ;;  %v253_v4 = vpack.c.bf16 %v27_v2, %v26_v1  ;;  %v22_v5 = vld [vmem:[%s349_s2 + $0x8] sm:$0xff]  ;;  %v29_v7 = vld [vmem:[%s348_s3 + $0x18] sm:$0xff]  ;;  %238 = vmatprep.mubr.msk.f32.mxu0 %vm278_vm0, %v279_v8  ;;  %249 = vmatprep.mubr.msk.f32.mxu1 %vm278_vm0, %v279_v8 }
   0x3   :  { %v259_v9 = vpack.c.bf16 %v22_v5, %v21_v3  ;;  %v23_v10 = vld [vmem:[%s349_s2 + $0x10] sm:$0xff]  ;;  %v24_v11 = vld [vmem:[%s349_s2 + $0x18] sm:$0xff]  ;;  %v256_v12 = vpack.c.bf16 %v29_v7, %v28_v6  ;;  %v25_v14 = vld [vmem:[%s350_s1] sm:$0xff]  ;;  %s280_s1 = smov 127  }
   0x4   :  { %254 = vmatpush3.bf16.msra.mxu0 %v253_v4  ;;  %v262_v13 = vpack.c.bf16 %v24_v11, %v23_v10  ;;  %v20_v15 = vld [vmem:[%s351_s0] sm:$0xff]  ;;  %s281_s0 = smov 1  }
   0x5   :  { %260 = vmatpush3.bf16.msra.mxu1 %v259_v9  ;;  %255 = vmatprep.subr.bf16.mxu0 %v277_v0  ;;  %v217_v18 = vld [vmem:[%s352_s4] ss:$0 sm:$0xff] }
   0x6   :  { %261 = vmatprep.subr.bf16.mxu1 %v277_v0 }
   0x8   :  { %257 = vmatpush3.bf16.msra.mxu0 %v256_v12 }
   0x9   :  { %263 = vmatpush3.bf16.msra.mxu1 %v262_v13 }
   0xb   :  { %239 = vmatmul.mubr.msk.f32.vlgmr.msra.gmra.mrb[0].mxu0 %vm30_vm1, %v25_v14 }
   0xc   :  { %250 = vmatmul.mubr.msk.f32.vlgmr.msra.gmra.mrb[0].mxu1 %vm30_vm1, %v20_v15 }
  0xde   :  { %v100_v16 = vpop.f32.mrb[0].mxu0 }
  0xdf   :  { %v173_v17 = vpop.f32.mrb[0].mxu1  ;;  %v240_v19 = vpop.f32.mrb[1].mxu0 }
  0xe0   :  { %v174_v20 = vadd.f32 %v173_v17, %v100_v16  ;;  %v251_v21 = vpop.f32.mrb[1].mxu1 }
  0xe2   :  { %v184_v22 = vadd.f32 %v217_v18, %v174_v20 }
  0xe4   :  { %v218_v23 = vmul.f32 -1.442695, %v184_v22 }
  0xe6   :  { %269 = vpow2.f32 %v218_v23 }
  0xf0   :  { %v270_v24 = vpop.eup %269 }
  0xf1   :  { %v188_v25 = vadd.f32 1.0, %v270_v24 }
  0xf3   :  { %271 = vrcp.f32 %v188_v25 }
  0xfd   :  { %v272_v26 = vpop.eup %271 }
  0xfe   :  { %192 = vrot.lane.b32.xlu0 %v272_v26, %s280_s1 }
 0x170   :  { %v193_v27 = vpop.permute.xlu0 %192 }
 0x171   :  { %v195_v28 = vsub.f32 %v272_v26, %v193_v27 }
 0x173   :  { %v219_v29 = vmul.f32 -1.442695, %v195_v28 }
 0x175   :  { %273 = vpow2.f32 %v219_v29 }
 0x17f   :  { %v274_v30 = vpop.eup %273 }
 0x180   :  { %v199_v31 = vadd.f32 1.0, %v274_v30 }
 0x182   :  { %275 = vrcp.f32 %v199_v31 }
 0x18c   :  { %v276_v32 = vpop.eup %275 }
 0x18d   :  { %v202_v33 = vsub.f32 1.0, %v276_v32 }
 0x18f   :  { %204 = vrot.lane.b32.xlu0 %v202_v33, %s281_s0 }
 0x201   :  { %v205_v34 = vpop.permute.xlu0 %204 }
 0x202   :  { %v208_v35 = vsel %vm207_vm2, %v276_v32, %v205_v34 }
 0x203   :  { %210 = vst.msk [vmem:[%s353_s5] sm:$0xff] %vm209_vm3, %v208_v35 }

</bundles_post_ra>
